<compile_context>
chip_gen: v7x
topology: tpu7x:2x2x1
jax: 0.10.0
libtpu: 0.0.40
codegen_flags: <defaults>
</compile_context>

<pallas_src>
import functools

import jax
import jax.numpy as jnp
from jax.experimental import pallas as pl
from jax.experimental.pallas import tpu as pltpu


def _round_up(x, m):
    return (x + m - 1) // m * m


def mlp_kernel(x_ref, w1_ref, b1_ref, w2_ref, b2_ref, w3_ref, ws_ref, bo_ref, o_ref):
    x = x_ref[...]                                                      # [TB, IN_P]

    # fc1 + ReLU
    h1 = jnp.dot(x, w1_ref[...], preferred_element_type=jnp.float32) + b1_ref[...]
    h1 = jnp.maximum(h1, 0.0)                                           # [TB, HID_P]

    # fc2 + ReLU
    h2 = jnp.dot(h1, w2_ref[...], preferred_element_type=jnp.float32) + b2_ref[...]
    h2 = jnp.maximum(h2, 0.0)                                           # [TB, HID_P]

    # fc3 + shortcut (bias pre-summed outside the kernel). No concat -> no lane copy.
    out = (
        jnp.dot(h2, w3_ref[...], preferred_element_type=jnp.float32)
        + jnp.dot(x, ws_ref[...], preferred_element_type=jnp.float32)
        + bo_ref[...]
    )
    o_ref[...] = out.astype(o_ref.dtype)                                # [TB, OUT_P]


@functools.partial(jax.jit, static_argnames=("block_batch",))
def mlp_forward(x, params, *, block_batch=256):
    """x: [B, input_size] f32. params: dict of [in, out] weights / [1, out] biases."""
    B, input_size = x.shape
    hidden_size = params["w1"].shape[1]
    output_size = params["w3"].shape[1]

    # Lane- / MXU-friendly padded feature sizes.
    IN_P = _round_up(input_size, 128)
    HID_P = _round_up(hidden_size, 128)
    OUT_P = _round_up(output_size, 128)

    def pad2(a, rows, cols):
        return jnp.pad(a, ((0, rows - a.shape[0]), (0, cols - a.shape[1])))

    # Zero-padded weights (zero rows/cols contribute nothing -> semantics preserved).
    w1p = pad2(params["w1"], IN_P, HID_P)
    b1p = pad2(params["b1"], 1, HID_P)
    w2p = pad2(params["w2"], HID_P, HID_P)
    b2p = pad2(params["b2"], 1, HID_P)
    w3p = pad2(params["w3"], HID_P, OUT_P)
    wsp = pad2(params["ws"], IN_P, OUT_P)
    bop = pad2(params["b3"] + params["bs"], 1, OUT_P)   # pre-summed output bias

    # Batch tiling (sublane multiple of 8; pad batch with zero rows).
    TB = min(block_batch, _round_up(B, 8))
    B_pad = _round_up(B, TB)
    xp = jnp.pad(x, ((0, B_pad - B), (0, IN_P - input_size)))

    grid = (B_pad // TB,)

    const2 = lambda shape: pl.BlockSpec(shape, lambda i: (0, 0))

    flops = 2 * B_pad * (IN_P * HID_P + HID_P * HID_P + HID_P * OUT_P + IN_P * OUT_P)
    bytes_accessed = 4 * (
        xp.size + w1p.size + b1p.size + w2p.size + b2p.size
        + w3p.size + wsp.size + bop.size + B_pad * OUT_P
    )

    out_padded = pl.pallas_call(
        mlp_kernel,
        out_shape=jax.ShapeDtypeStruct((B_pad, OUT_P), jnp.float32),
        grid_spec=pltpu.PrefetchScalarGridSpec(
            num_scalar_prefetch=0,
            grid=grid,
            in_specs=[
                pl.BlockSpec((TB, IN_P), lambda i: (i, 0)),   # x: batch-tiled, pipelined
                const2(w1p.shape), const2(b1p.shape),         # weights: VMEM-resident
                const2(w2p.shape), const2(b2p.shape),
                const2(w3p.shape), const2(wsp.shape), const2(bop.shape),
            ],
            out_specs=pl.BlockSpec((TB, OUT_P), lambda i: (i, 0)),
        ),
        compiler_params=pltpu.CompilerParams(
            dimension_semantics=("parallel",),                # shard batch across TCs (v7x)
            vmem_limit_bytes=32 * 1024 * 1024,
        ),
        cost_estimate=pl.CostEstimate(
            flops=flops, transcendentals=0, bytes_accessed=bytes_accessed
        ),
    )(xp, w1p, b1p, w2p, b2p, w3p, wsp, bop)

    # Drop batch / lane padding outside the kernel.
    return out_padded[:B, :output_size]


def init_params(key, input_size, hidden_size, output_size):
    """Deterministic init mimicking nn.Linear (uniform +/- 1/sqrt(fan_in)).
    Weights stored as [in, out] (transposed vs. PyTorch's [out, in])."""
    def linear(k, fan_in, fan_out):
        kw, kb = jax.random.split(k)
        bound = 1.0 / jnp.sqrt(fan_in)
        w = jax.random.uniform(kw, (fan_in, fan_out), jnp.float32, -bound, bound)
        b = jax.random.uniform(kb, (1, fan_out), jnp.float32, -bound, bound)
        return w, b

    k1, k2, k3, k4 = jax.random.split(key, 4)
    w1, b1 = linear(k1, input_size, hidden_size)
    w2, b2 = linear(k2, hidden_size, hidden_size)
    w3, b3 = linear(k3, hidden_size, output_size)
    ws, bs = linear(k4, input_size, output_size)
    return {"w1": w1, "b1": b1, "w2": w2, "b2": b2,
            "w3": w3, "b3": b3, "ws": ws, "bs": bs}


def mlp_reference(x, p):
    h1 = jax.nn.relu(x @ p["w1"] + p["b1"])
    h2 = jax.nn.relu(h1 @ p["w2"] + p["b2"])
    return (h2 @ p["w3"] + p["b3"]) + (x @ p["ws"] + p["bs"])


if __name__ == "__main__":
    batch, input_size, hidden_size, output_size = 256, 16, 32, 8

    key = jax.random.PRNGKey(0)
    kx, kp = jax.random.split(key)
    x = jax.random.normal(kx, (batch, input_size), jnp.float32)
    params = init_params(kp, input_size, hidden_size, output_size)

    out = mlp_forward(x, params, block_batch=128)   # grid=(2,), 128-row batch tiles
    jax.block_until_ready(out)

    ref = mlp_reference(x, params)
    assert out.shape == (batch, output_size)
    assert jnp.allclose(out, ref, atol=1e-5, rtol=1e-5)

    print("KERNEL_OK")
</pallas_src>

<mosaic_0001>
module attributes {stable_mosaic.version = 11 : i64} {
  func.func @mlp_kernel(%arg0: i32, %arg1: memref<128x128xf32, #tpu.memory_space<vmem>>, %arg2: memref<128x128xf32, #tpu.memory_space<vmem>>, %arg3: memref<1x128xf32, #tpu.memory_space<vmem>>, %arg4: memref<128x128xf32, #tpu.memory_space<vmem>>, %arg5: memref<1x128xf32, #tpu.memory_space<vmem>>, %arg6: memref<128x128xf32, #tpu.memory_space<vmem>>, %arg7: memref<128x128xf32, #tpu.memory_space<vmem>>, %arg8: memref<1x128xf32, #tpu.memory_space<vmem>>, %arg9: memref<128x128xf32, #tpu.memory_space<vmem>>) attributes {dimension_semantics = [#tpu.dimension_semantics<parallel>], iteration_bounds = array<i64: 2>, scalar_prefetch = 0 : i64, scratch_operands = 0 : i64, tpu.core_type = #tpu.core_type<tc>, window_params = [{transform_indices = @transform_0, window_bounds = array<i64: 128, 128>}, {pipeline_mode = #tpu.pipeline_mode<synchronous>, transform_indices = @transform_1, window_bounds = array<i64: 128, 128>}, {pipeline_mode = #tpu.pipeline_mode<synchronous>, transform_indices = @transform_2, window_bounds = array<i64: 1, 128>}, {pipeline_mode = #tpu.pipeline_mode<synchronous>, transform_indices = @transform_3, window_bounds = array<i64: 128, 128>}, {pipeline_mode = #tpu.pipeline_mode<synchronous>, transform_indices = @transform_4, window_bounds = array<i64: 1, 128>}, {pipeline_mode = #tpu.pipeline_mode<synchronous>, transform_indices = @transform_5, window_bounds = array<i64: 128, 128>}, {pipeline_mode = #tpu.pipeline_mode<synchronous>, transform_indices = @transform_6, window_bounds = array<i64: 128, 128>}, {pipeline_mode = #tpu.pipeline_mode<synchronous>, transform_indices = @transform_7, window_bounds = array<i64: 1, 128>}, {transform_indices = @transform_8, window_bounds = array<i64: 128, 128>}]} {
    %c0 = arith.constant 0 : index
    %c0_0 = arith.constant 0 : index
    %0 = vector.load %arg1[%c0, %c0_0] : memref<128x128xf32, #tpu.memory_space<vmem>>, vector<128x128xf32>
    %c0_1 = arith.constant 0 : index
    %c0_2 = arith.constant 0 : index
    %1 = vector.load %arg2[%c0_1, %c0_2] : memref<128x128xf32, #tpu.memory_space<vmem>>, vector<128x128xf32>
    %cst = arith.constant dense<0.000000e+00> : vector<128x128xf32>
    %2 = tpu.matmul %0, %1, %cst {dimension_numbers = #tpu.dot_dimension_numbers<[1], [0], [0], [1], [0, 0, 1, 1], [], []>} : vector<128x128xf32>, vector<128x128xf32>, vector<128x128xf32> -> vector<128x128xf32>
    %c0_3 = arith.constant 0 : index
    %c0_4 = arith.constant 0 : index
    %3 = vector.load %arg3[%c0_3, %c0_4] : memref<1x128xf32, #tpu.memory_space<vmem>>, vector<1x128xf32>
    %4 = vector.broadcast %3 : vector<1x128xf32> to vector<128x128xf32>
    %5 = arith.addf %2, %4 : vector<128x128xf32>
    %cst_5 = arith.constant 0.000000e+00 : f32
    %6 = vector.broadcast %cst_5 : f32 to vector<128x128xf32>
    %7 = arith.maximumf %5, %6 : vector<128x128xf32>
    %c0_6 = arith.constant 0 : index
    %c0_7 = arith.constant 0 : index
    %8 = vector.load %arg4[%c0_6, %c0_7] : memref<128x128xf32, #tpu.memory_space<vmem>>, vector<128x128xf32>
    %cst_8 = arith.constant dense<0.000000e+00> : vector<128x128xf32>
    %9 = tpu.matmul %7, %8, %cst_8 {dimension_numbers = #tpu.dot_dimension_numbers<[1], [0], [0], [1], [0, 0, 1, 1], [], []>} : vector<128x128xf32>, vector<128x128xf32>, vector<128x128xf32> -> vector<128x128xf32>
    %c0_9 = arith.constant 0 : index
    %c0_10 = arith.constant 0 : index
    %10 = vector.load %arg5[%c0_9, %c0_10] : memref<1x128xf32, #tpu.memory_space<vmem>>, vector<1x128xf32>
    %11 = vector.broadcast %10 : vector<1x128xf32> to vector<128x128xf32>
    %12 = arith.addf %9, %11 : vector<128x128xf32>
    %cst_11 = arith.constant 0.000000e+00 : f32
    %13 = vector.broadcast %cst_11 : f32 to vector<128x128xf32>
    %14 = arith.maximumf %12, %13 : vector<128x128xf32>
    %c0_12 = arith.constant 0 : index
    %c0_13 = arith.constant 0 : index
    %15 = vector.load %arg6[%c0_12, %c0_13] : memref<128x128xf32, #tpu.memory_space<vmem>>, vector<128x128xf32>
    %cst_14 = arith.constant dense<0.000000e+00> : vector<128x128xf32>
    %16 = tpu.matmul %14, %15, %cst_14 {dimension_numbers = #tpu.dot_dimension_numbers<[1], [0], [0], [1], [0, 0, 1, 1], [], []>} : vector<128x128xf32>, vector<128x128xf32>, vector<128x128xf32> -> vector<128x128xf32>
    %c0_15 = arith.constant 0 : index
    %c0_16 = arith.constant 0 : index
    %17 = vector.load %arg7[%c0_15, %c0_16] : memref<128x128xf32, #tpu.memory_space<vmem>>, vector<128x128xf32>
    %cst_17 = arith.constant dense<0.000000e+00> : vector<128x128xf32>
    %18 = tpu.matmul %0, %17, %cst_17 {dimension_numbers = #tpu.dot_dimension_numbers<[1], [0], [0], [1], [0, 0, 1, 1], [], []>} : vector<128x128xf32>, vector<128x128xf32>, vector<128x128xf32> -> vector<128x128xf32>
    %19 = arith.addf %16, %18 : vector<128x128xf32>
    %c0_18 = arith.constant 0 : index
    %c0_19 = arith.constant 0 : index
    %20 = vector.load %arg8[%c0_18, %c0_19] : memref<1x128xf32, #tpu.memory_space<vmem>>, vector<1x128xf32>
    %21 = vector.broadcast %20 : vector<1x128xf32> to vector<128x128xf32>
    %22 = arith.addf %19, %21 : vector<128x128xf32>
    %c0_20 = arith.constant 0 : index
    %c0_21 = arith.constant 0 : index
    %23 = vector.load %arg9[%c0_20, %c0_21] : memref<128x128xf32, #tpu.memory_space<vmem>>, vector<128x128xf32>
    tpu.vector_store %arg9[%c0_20, %c0_21], %22 {strides = array<i32>} : memref<128x128xf32, #tpu.memory_space<vmem>>, vector<128x128xf32>,
    return
  }
  func.func @transform_0(%arg0: i32) -> (i32, i32) {
    %c0_i32 = arith.constant 0 : i32
    %c0_i32_0 = arith.constant 0 : i32
    return %arg0, %c0_i32 : i32, i32
  }
  func.func @transform_1(%arg0: i32) -> (i32, i32) {
    %c0_i32 = arith.constant 0 : i32
    %c0_i32_0 = arith.constant 0 : i32
    %c0_i32_1 = arith.constant 0 : i32
    return %c0_i32, %c0_i32_0 : i32, i32
  }
  func.func @transform_2(%arg0: i32) -> (i32, i32) {
    %c0_i32 = arith.constant 0 : i32
    %c0_i32_0 = arith.constant 0 : i32
    %c0_i32_1 = arith.constant 0 : i32
    return %c0_i32, %c0_i32_0 : i32, i32
  }
  func.func @transform_3(%arg0: i32) -> (i32, i32) {
    %c0_i32 = arith.constant 0 : i32
    %c0_i32_0 = arith.constant 0 : i32
    %c0_i32_1 = arith.constant 0 : i32
    return %c0_i32, %c0_i32_0 : i32, i32
  }
  func.func @transform_4(%arg0: i32) -> (i32, i32) {
    %c0_i32 = arith.constant 0 : i32
    %c0_i32_0 = arith.constant 0 : i32
    %c0_i32_1 = arith.constant 0 : i32
    return %c0_i32, %c0_i32_0 : i32, i32
  }
  func.func @transform_5(%arg0: i32) -> (i32, i32) {
    %c0_i32 = arith.constant 0 : i32
    %c0_i32_0 = arith.constant 0 : i32
    %c0_i32_1 = arith.constant 0 : i32
    return %c0_i32, %c0_i32_0 : i32, i32
  }
  func.func @transform_6(%arg0: i32) -> (i32, i32) {
    %c0_i32 = arith.constant 0 : i32
    %c0_i32_0 = arith.constant 0 : i32
    %c0_i32_1 = arith.constant 0 : i32
    return %c0_i32, %c0_i32_0 : i32, i32
  }
  func.func @transform_7(%arg0: i32) -> (i32, i32) {
    %c0_i32 = arith.constant 0 : i32
    %c0_i32_0 = arith.constant 0 : i32
    %c0_i32_1 = arith.constant 0 : i32
    return %c0_i32, %c0_i32_0 : i32, i32
  }
  func.func @transform_8(%arg0: i32) -> (i32, i32) {
    %c0_i32 = arith.constant 0 : i32
    %c0_i32_0 = arith.constant 0 : i32
    return %arg0, %c0_i32 : i32, i32
  }
}

</mosaic_0001>

<bundles_post_ra>
// kernel: mlp_forward.1
= control target key start
LH: loop header
LB: loop body
LE: loop exit
PB: predicated region body
PF: predicated region fallthrough
CT: control target
= control target key end

     0   :  { %s1681_s27 = smov 0   ;;  %s2002_s0 = inlined_call_operand.vmem [shape: f32[256,128], index: 0, kind: input, shape index: {}]   ;;  %s2003_s1 = inlined_call_operand.vmem [shape: f32[128,128], index: 1, kind: input, shape index: {}]   ;;  %s2004_s2 = inlined_call_operand.vmem [shape: f32[1,128], index: 2, kind: input, shape index: {}]   ;;  %s2005_s3 = inlined_call_operand.vmem [shape: f32[128,128], index: 3, kind: input, shape index: {}]   ;;  %s2006_s4 = inlined_call_operand.vmem [shape: f32[1,128], index: 4, kind: input, shape index: {}]   ;;  %s2007_s5 = inlined_call_operand.vmem [shape: f32[128,128], index: 5, kind: input, shape index: {}]   ;;  %s2008_s6 = inlined_call_operand.vmem [shape: f32[128,128], index: 6, kind: input, shape index: {}]   ;;  %s2009_s7 = inlined_call_operand.vmem [shape: f32[1,128], index: 7, kind: input, shape index: {}]   ;;  %s2010_s8 = inlined_call_operand.vmem [shape: f32[256,128], index: 8, kind: output, shape index: {}]  }
   0x1 LB: > { %s1110_s28 = sadd.s32 4294967295, %s1634_s27   ;;  %p1114_p0 = scmp.ge.s32.totalorder %s1634_s27, 1  ;;  %s1634_s27 = sphi %s1681_s27, %s18_s27  }
   0x2   : > { %p263_p1 = scmp.lt.s32.totalorder %s1634_s27, 3 }
   0x4   : > { %p264_p2 = pnand %p1114_p0, %p263_p1 }
   0x5   : > { %v325_v0 = vld [vmem:[%s2003_s1] sm:$0xff] (!%p264_p2)  ;;  %v326_v1 = vld [vmem:[%s2003_s1 + $0x8] sm:$0xff] (!%p264_p2)  ;;  %v327_v2 = vld [vmem:[%s2003_s1 + $0x10] sm:$0xff] (!%p264_p2)  ;;  %s1115_s13 = sshll.u32 (!%p264_p2), %s1110_s28, 4 }
   0x6   : > { %267 = sbr.rel (%p264_p2) target bundleno = 721 (0x2d1), region = 52  ;;  %v1476_v3 = vpack.c.bf16 (!%p264_p2), %v326_v1, %v325_v0  ;;  %v328_v4 = vld [vmem:[%s2003_s1 + $0x18] sm:$0xff] (!%p264_p2)  ;;  %p298_p3 = scmp.lt.s32.totalorder (!%p264_p2), %s1115_s13, 31  ;;  %v329_v6 = vld [vmem:[%s2003_s1 + $0x20] sm:$0xff] (!%p264_p2)  ;;  %v330_v7 = vld [vmem:[%s2003_s1 + $0x28] sm:$0xff] (!%p264_p2) }
   0x7   : > { %v1480_v5 = vpack.c.bf16 (!%p264_p2), %v328_v4, %v327_v2  ;;  %v1484_v8 = vpack.c.bf16 (!%p264_p2), %v330_v7, %v329_v6  ;;  %v331_v9 = vld [vmem:[%s2003_s1 + $0x30] sm:$0xff] (!%p264_p2)  ;;  %v332_v10 = vld [vmem:[%s2003_s1 + $0x38] sm:$0xff] (!%p264_p2)  ;;  %v333_v13 = vld [vmem:[%s2003_s1 + $0x40] sm:$0xff] (!%p264_p2) }
   0x8   : > { %1477 = vmatprep.subr.bf16.mxu1 (!%p264_p2), %v1476_v3  ;;  %v1488_v12 = vpack.c.bf16 (!%p264_p2), %v332_v10, %v331_v9  ;;  %v334_v14 = vld [vmem:[%s2003_s1 + $0x48] sm:$0xff] (!%p264_p2)  ;;  %v335_v16 = vld [vmem:[%s2003_s1 + $0x50] sm:$0xff] (!%p264_p2)  ;;  %v336_v17 = vld [vmem:[%s2003_s1 + $0x58] sm:$0xff] (!%p264_p2) }
   0x9   : > { %1479 = vmatpush3.bf16.msra.mxu1 (!%p264_p2), %v1476_v3  ;;  %v1492_v15 = vpack.c.bf16 (!%p264_p2), %v334_v14, %v333_v13  ;;  %v1496_v18 = vpack.c.bf16 (!%p264_p2), %v336_v17, %v335_v16  ;;  %v337_v19 = vld [vmem:[%s2003_s1 + $0x60] sm:$0xff] (!%p264_p2)  ;;  %v338_v20 = vld [vmem:[%s2003_s1 + $0x68] sm:$0xff] (!%p264_p2)  ;;  %v339_v22 = vld [vmem:[%s2003_s1 + $0x70] sm:$0xff] (!%p264_p2) }
   0xa   : > { %1481 = vmatprep.subr.bf16.mxu1 (!%p264_p2), %v1480_v5  ;;  %v1500_v21 = vpack.c.bf16 (!%p264_p2), %v338_v20, %v337_v19  ;;  %v340_v23 = vld [vmem:[%s2003_s1 + $0x78] sm:$0xff] (!%p264_p2)  ;;  %v509_v25 = vld [vmem:[%s2005_s3] sm:$0xff] (!%p264_p2)  ;;  %v510_v26 = vld [vmem:[%s2005_s3 + $0x8] sm:$0xff] (!%p264_p2) }
   0xb   : > { %v1504_v24 = vpack.c.bf16 (!%p264_p2), %v340_v23, %v339_v22  ;;  %v1508_v27 = vpack.c.bf16 (!%p264_p2), %v510_v26, %v509_v25  ;;  %v511_v28 = vld [vmem:[%s2005_s3 + $0x10] sm:$0xff] (!%p264_p2)  ;;  %v512_v29 = vld [vmem:[%s2005_s3 + $0x18] sm:$0xff] (!%p264_p2)  ;;  %v513_v33 = vld [vmem:[%s2005_s3 + $0x20] sm:$0xff] (!%p264_p2) }
   0xc   : > { %v1512_v32 = vpack.c.bf16 (!%p264_p2), %v512_v29, %v511_v28  ;;  %v514_v34 = vld [vmem:[%s2005_s3 + $0x28] sm:$0xff] (!%p264_p2)  ;;  %v515_v38 = vld [vmem:[%s2005_s3 + $0x30] sm:$0xff] (!%p264_p2)  ;;  %v516_v39 = vld [vmem:[%s2005_s3 + $0x38] sm:$0xff] (!%p264_p2) }
   0xd   : > { %s2012_s13 = smov (!%p298_p3, %s1115_s13), 31  ;;  %1483 = vmatpush3.bf16.msra.mxu1 %v1480_v5  ;;  %v1516_v37 = vpack.c.bf16 %v514_v34, %v513_v33  ;;  %v1520_v42 = vpack.c.bf16 %v516_v39, %v515_v38  ;;  %v517_v43 = vld [vmem:[%s2005_s3 + $0x40] sm:$0xff]  ;;  %v518_v44 = vld [vmem:[%s2005_s3 + $0x48] sm:$0xff]  ;;  %v519_v48 = vld [vmem:[%s2005_s3 + $0x50] sm:$0xff] }
   0xe   : > { %s1116_s20 = sshll.u32 %s2012_s13, 3  ;;  %1485 = vmatprep.subr.bf16.mxu1 %v1484_v8  ;;  %v1524_v47 = vpack.c.bf16 %v518_v44, %v517_v43  ;;  %v520_v49 = vld [vmem:[%s2005_s3 + $0x58] sm:$0xff]  ;;  %v521_v53 = vld [vmem:[%s2005_s3 + $0x60] sm:$0xff]  ;;  %v522_v54 = vld [vmem:[%s2005_s3 + $0x68] sm:$0xff] }
   0xf   : > { %s1721_s28 = scalar_lea.vmem %s2002_s0, %s1116_s20  ;;  %v1528_v52 = vpack.c.bf16 %v520_v49, %v519_v48  ;;  %v1532_v57 = vpack.c.bf16 %v522_v54, %v521_v53  ;;  %v523_v61 = vld [vmem:[%s2005_s3 + $0x70] sm:$0xff]  ;;  %v524_v62 = vld [vmem:[%s2005_s3 + $0x78] sm:$0xff]  ;;  %v709_v0 = vld [vmem:[%s2008_s6] sm:$0xff]  ;;  %s1981_s16 = scalar_lea.vmem %s2010_s8, %s1116_s20 }
  0x10   : > { %v309_v11 = vld [vmem:[%s1721_s28] sm:$0xff]  ;;  %v1761_v30 = vld [vmem:[%s1721_s28 + $0x8] sm:$0xff]  ;;  %v1764_v31 = vld [vmem:[%s1721_s28 + $0x10] sm:$0xff]  ;;  %v1536_v63 = vpack.c.bf16 %v524_v62, %v523_v61 }
  0x11   : > { %1284 = vmatprep.mubr.f32.mxu1 %v309_v11  ;;  %1396 = vmatprep.mubr.f32.mxu0 %v309_v11  ;;  %v1775_v35 = vld [vmem:[%s1721_s28 + $0x18] sm:$0xff]  ;;  %v1778_v36 = vld [vmem:[%s1721_s28 + $0x20] sm:$0xff]  ;;  %v1789_v40 = vld [vmem:[%s1721_s28 + $0x28] sm:$0xff] }
  0x12   : > { %1487 = vmatpush3.bf16.msra.mxu1 %v1484_v8  ;;  %v1792_v41 = vld [vmem:[%s1721_s28 + $0x30] sm:$0xff]  ;;  %v1803_v45 = vld [vmem:[%s1721_s28 + $0x38] sm:$0xff]  ;;  %v1806_v46 = vld [vmem:[%s1721_s28 + $0x40] sm:$0xff] }
  0x13   : > { %1489 = vmatprep.subr.bf16.mxu1 %v1488_v12  ;;  %v1817_v50 = vld [vmem:[%s1721_s28 + $0x48] sm:$0xff]  ;;  %v1820_v51 = vld [vmem:[%s1721_s28 + $0x50] sm:$0xff]  ;;  %v1831_v55 = vld [vmem:[%s1721_s28 + $0x58] sm:$0xff] }
  0x14   : > { %v1834_v56 = vld [vmem:[%s1721_s28 + $0x60] sm:$0xff]  ;;  %v1839_v58 = vld [vmem:[%s1721_s28 + $0x68] sm:$0xff]  ;;  %v1842_v59 = vld [vmem:[%s1721_s28 + $0x70] sm:$0xff] }
  0x15   : > { %v1847_v60 = vld [vmem:[%s1721_s28 + $0x78] sm:$0xff]  ;;  %v710_v1 = vld [vmem:[%s2008_s6 + $0x8] sm:$0xff]  ;;  %v711_v2 = vld [vmem:[%s2008_s6 + $0x10] sm:$0xff] }
  0x16   : > { %1491 = vmatpush3.bf16.msra.mxu1 %v1488_v12  ;;  %v1540_v3 = vpack.c.bf16 %v710_v1, %v709_v0  ;;  %v712_v4 = vld [vmem:[%s2008_s6 + $0x18] sm:$0xff]  ;;  %v713_v6 = vld [vmem:[%s2008_s6 + $0x20] sm:$0xff]  ;;  %v714_v7 = vld [vmem:[%s2008_s6 + $0x28] sm:$0xff] }
  0x17   : > { %1493 = vmatprep.subr.bf16.mxu1 %v1492_v15  ;;  %v1544_v5 = vpack.c.bf16 %v712_v4, %v711_v2  ;;  %v1548_v8 = vpack.c.bf16 %v714_v7, %v713_v6  ;;  %v715_v9 = vld [vmem:[%s2008_s6 + $0x30] sm:$0xff]  ;;  %v716_v10 = vld [vmem:[%s2008_s6 + $0x38] sm:$0xff]  ;;  %v717_v12 = vld [vmem:[%s2008_s6 + $0x40] sm:$0xff] }
  0x18   : > { %1541 = vmatprep.subr.bf16.mxu0 %v1540_v3  ;;  %v1552_v11 = vpack.c.bf16 %v716_v10, %v715_v9  ;;  %v718_v13 = vld [vmem:[%s2008_s6 + $0x48] sm:$0xff]  ;;  %v720_v16 = vld [vmem:[%s2008_s6 + $0x58] sm:$0xff] }
  0x19   : > { %1543 = vmatpush3.bf16.msra.mxu0 %v1540_v3  ;;  %v1556_v14 = vpack.c.bf16 %v718_v13, %v717_v12  ;;  %v722_v19 = vld [vmem:[%s2008_s6 + $0x68] sm:$0xff]  ;;  %v724_v22 = vld [vmem:[%s2008_s6 + $0x78] sm:$0xff] }
  0x1a   : > { %1495 = vmatpush3.bf16.msra.mxu1 %v1492_v15  ;;  %1545 = vmatprep.subr.bf16.mxu0 %v1544_v5  ;;  %v719_v15 = vld [vmem:[%s2008_s6 + $0x50] sm:$0xff]  ;;  %v694_v25 = vld [vmem:[%s2007_s5 + $0x8] sm:$0xff]  ;;  %v696_v28 = vld [vmem:[%s2007_s5 + $0x18] sm:$0xff] }
  0x1b   : > { %1497 = vmatprep.subr.bf16.mxu1 %v1496_v18  ;;  %v1560_v17 = vpack.c.bf16 %v720_v16, %v719_v15  ;;  %v698_v33 = vld [vmem:[%s2007_s5 + $0x28] sm:$0xff]  ;;  %v700_v38 = vld [vmem:[%s2007_s5 + $0x38] sm:$0xff] }
  0x1c   : > { %v702_v39 = vld [vmem:[%s2007_s5 + $0x48] sm:$0xff] }
  0x1d   : > { %1547 = vmatpush3.bf16.msra.mxu0 %v1544_v5  ;;  %v706_v43 = vld [vmem:[%s2007_s5 + $0x68] sm:$0xff] }
  0x1e   : > { %1499 = vmatpush3.bf16.msra.mxu1 %v1496_v18  ;;  %1549 = vmatprep.subr.bf16.mxu0 %v1548_v8  ;;  %v721_v18 = vld [vmem:[%s2008_s6 + $0x60] sm:$0xff] }
  0x1f   : > { %1501 = vmatprep.subr.bf16.mxu1 %v1500_v21  ;;  %v1564_v20 = vpack.c.bf16 %v722_v19, %v721_v18 }
  0x21   : > { %1551 = vmatpush3.bf16.msra.mxu0 %v1548_v8 }
  0x22   : > { %1503 = vmatpush3.bf16.msra.mxu1 %v1500_v21  ;;  %1553 = vmatprep.subr.bf16.mxu0 %v1552_v11  ;;  %v723_v21 = vld [vmem:[%s2008_s6 + $0x70] sm:$0xff] }
  0x23   : > { %1505 = vmatprep.subr.bf16.mxu1 %v1504_v24  ;;  %v1568_v23 = vpack.c.bf16 %v724_v22, %v723_v21 }
  0x25   : > { %1555 = vmatpush3.bf16.msra.mxu0 %v1552_v11 }
  0x26   : > { %1507 = vmatpush3.bf16.msra.mxu1 %v1504_v24  ;;  %1557 = vmatprep.subr.bf16.mxu0 %v1556_v14  ;;  %v693_v24 = vld [vmem:[%s2007_s5] sm:$0xff] }
  0x27   : > { %1509 = vmatprep.subr.bf16.mxu1 %v1508_v27  ;;  %v1572_v26 = vpack.c.bf16 %v694_v25, %v693_v24 }
  0x29   : > { %1285 = vmatmul.mubr.f32.vlgmr.msra.gmra.mrb[0].mxu1 %v1761_v30  ;;  %1559 = vmatpush3.bf16.msra.mxu0 %v1556_v14 }
  0x2a   : > { %1287 = vmatprep.mubr.f32.mxu1 %v1764_v31  ;;  %1511 = vmatpush3.bf16.msra.mxu1 %v1508_v27  ;;  %v695_v27 = vld [vmem:[%s2007_s5 + $0x10] sm:$0xff] }
  0x2b   : > { %1513 = vmatprep.subr.bf16.mxu1 %v1512_v32  ;;  %1561 = vmatprep.subr.bf16.mxu0 %v1560_v17  ;;  %v1576_v29 = vpack.c.bf16 %v696_v28, %v695_v27 }
  0x2d   : > { %1288 = vmatmul.mubr.f32.gmra.mrb[2].mxu1 %v1775_v35  ;;  %1563 = vmatpush3.bf16.msra.mxu0 %v1560_v17 }
  0x2e   : > { %1290 = vmatprep.mubr.f32.mxu1 %v1778_v36  ;;  %1515 = vmatpush3.bf16.msra.mxu1 %v1512_v32  ;;  %v697_v32 = vld [vmem:[%s2007_s5 + $0x20] sm:$0xff] }
  0x2f   : > { %1517 = vmatprep.subr.bf16.mxu1 %v1516_v37  ;;  %1565 = vmatprep.subr.bf16.mxu0 %v1564_v20  ;;  %v1580_v34 = vpack.c.bf16 %v698_v33, %v697_v32  ;;  %v707_v32 = vld [vmem:[%s2007_s5 + $0x70] sm:$0xff]  ;;  %v708_v33 = vld [vmem:[%s2007_s5 + $0x78] sm:$0xff] }
  0x31   : > { %1291 = vmatmul.mubr.f32.gmra.mrb[4].mxu1 %v1789_v40  ;;  %1567 = vmatpush3.bf16.msra.mxu0 %v1564_v20 }
  0x32   : > { %1293 = vmatprep.mubr.f32.mxu1 %v1792_v41  ;;  %1519 = vmatpush3.bf16.msra.mxu1 %v1516_v37  ;;  %v699_v37 = vld [vmem:[%s2007_s5 + $0x30] sm:$0xff] }
  0x33   : > { %1521 = vmatprep.subr.bf16.mxu1 %v1520_v42  ;;  %1569 = vmatprep.subr.bf16.mxu0 %v1568_v23 }
  0x35   : > { %1294 = vmatmul.mubr.f32.gmra.mrb[6].mxu1 %v1803_v45  ;;  %1571 = vmatpush3.bf16.msra.mxu0 %v1568_v23 }
  0x36   : > { %1296 = vmatprep.mubr.f32.mxu1 %v1806_v46  ;;  %1523 = vmatpush3.bf16.msra.mxu1 %v1520_v42  ;;  %v704_v42 = vld [vmem:[%s2007_s5 + $0x58] sm:$0xff] }
  0x37   : > { %1525 = vmatprep.subr.bf16.mxu1 %v1524_v47  ;;  %1573 = vmatprep.subr.bf16.mxu0 %v1572_v26 }
  0x38   : > { %1397 = vmatmul.mubr.f32.vlgmr.msra.gmra.mrb[0].mxu0 %v1761_v30  ;;  %v1584_v30 = vpack.c.bf16 %v700_v38, %v699_v37  ;;  %v1120_v37 = vld [vmem:[%s2006_s4] ss:$0 sm:$0xff] }
  0x39   : > { %1297 = vmatmul.mubr.f32.gmra.mrb[8].mxu1 %v1817_v50  ;;  %1575 = vmatpush3.bf16.msra.mxu0 %v1572_v26 }
  0x3a   : > { %1299 = vmatprep.mubr.f32.mxu1 %v1820_v51  ;;  %1527 = vmatpush3.bf16.msra.mxu1 %v1524_v47 }
  0x3b   : > { %1529 = vmatprep.subr.bf16.mxu1 %v1528_v52  ;;  %1399 = vmatprep.mubr.f32.mxu0 %v1764_v31  ;;  %v701_v31 = vld [vmem:[%s2007_s5 + $0x40] sm:$0xff] }
  0x3c   : > { %1577 = vmatprep.subr.bf16.mxu0 %v1576_v29  ;;  %1400 = vmatmul.mubr.f32.gmra.mrb[2].mxu0 %v1775_v35  ;;  %v1588_v35 = vpack.c.bf16 %v702_v39, %v701_v31 }
  0x3d   : > { %1300 = vmatmul.mubr.f32.gmra.mrb[10].mxu1 %v1831_v55  ;;  %1579 = vmatpush3.bf16.msra.mxu0 %v1576_v29 }
  0x3e   : > { %1302 = vmatprep.mubr.f32.mxu1 %v1834_v56  ;;  %1531 = vmatpush3.bf16.msra.mxu1 %v1528_v52 }
  0x3f   : > { %1533 = vmatprep.subr.bf16.mxu1 %v1532_v57  ;;  %1402 = vmatprep.mubr.f32.mxu0 %v1778_v36  ;;  %v703_v36 = vld [vmem:[%s2007_s5 + $0x50] sm:$0xff] }
  0x40   : > { %1581 = vmatprep.subr.bf16.mxu0 %v1580_v34  ;;  %1403 = vmatmul.mubr.f32.gmra.mrb[4].mxu0 %v1789_v40  ;;  %v1592_v40 = vpack.c.bf16 %v704_v42, %v703_v36 }
  0x41   : > { %1303 = vmatmul.mubr.f32.gmra.mrb[12].mxu1 %v1839_v58  ;;  %1583 = vmatpush3.bf16.msra.mxu0 %v1580_v34  ;;  %v1600_v34 = vpack.c.bf16 %v708_v33, %v707_v32 }
  0x42   : > { %1305 = vmatprep.mubr.f32.mxu1 %v1842_v59  ;;  %1535 = vmatpush3.bf16.msra.mxu1 %v1532_v57 }
  0x43   : > { %1537 = vmatprep.subr.bf16.mxu1 %v1536_v63  ;;  %1405 = vmatprep.mubr.f32.mxu0 %v1792_v41  ;;  %v705_v41 = vld [vmem:[%s2007_s5 + $0x60] sm:$0xff] }
  0x44   : > { %1585 = vmatprep.subr.bf16.mxu0 %v1584_v30  ;;  %1406 = vmatmul.mubr.f32.gmra.mrb[6].mxu0 %v1803_v45  ;;  %v1596_v44 = vpack.c.bf16 %v706_v43, %v705_v41  ;;  %v1119_v45 = vld [vmem:[%s2004_s2] ss:$0 sm:$0xff] }
  0x45   : > { %1306 = vmatmul.mubr.f32.gmra.mrb[14].mxu1 %v1847_v60  ;;  %1587 = vmatpush3.bf16.msra.mxu0 %v1584_v30 }
  0x46   : > { %1539 = vmatpush3.bf16.msra.mxu1 %v1536_v63  ;;  %1408 = vmatprep.mubr.f32.mxu0 %v1806_v46 }
  0x47   : > { %1589 = vmatprep.subr.bf16.mxu0 %v1588_v35 }
  0x48   : > { %1409 = vmatmul.mubr.f32.gmra.mrb[8].mxu0 %v1817_v50 }
  0x49   : > { %1591 = vmatpush3.bf16.msra.mxu0 %v1588_v35  ;;  %1411 = vmatprep.mubr.f32.mxu0 %v1820_v51 }
  0x4a   : > { %1593 = vmatprep.subr.bf16.mxu0 %v1592_v40 }
  0x4c   : > { %1412 = vmatmul.mubr.f32.gmra.mrb[10].mxu0 %v1831_v55 }
  0x4d   : > { %1595 = vmatpush3.bf16.msra.mxu0 %v1592_v40  ;;  %1414 = vmatprep.mubr.f32.mxu0 %v1834_v56 }
  0x4e   : > { %1597 = vmatprep.subr.bf16.mxu0 %v1596_v44 }
  0x50   : > { %1415 = vmatmul.mubr.f32.gmra.mrb[12].mxu0 %v1839_v58 }
  0x51   : > { %1599 = vmatpush3.bf16.msra.mxu0 %v1596_v44  ;;  %1417 = vmatprep.mubr.f32.mxu0 %v1842_v59 }
  0x52   : > { %1601 = vmatprep.subr.bf16.mxu0 %v1600_v34 }
  0x54   : > { %1418 = vmatmul.mubr.f32.gmra.mrb[14].mxu0 %v1847_v60 }
  0x55   : > { %1603 = vmatpush3.bf16.msra.mxu0 %v1600_v34 }
  0xfc   : > { %v1286_v46 = vpop.f32.mrb[0].mxu1 }
  0xfd   : > { %v420_v47 = vadd.f32 %v1286_v46, %v1119_v45  ;;  %v414_v48 = vpop.f32.mrb[1].mxu1 }
  0xfe   : > { %v415_v49 = vadd.f32 %v1119_v45, %v414_v48 }
  0xff   : > { %v494_v52 = vmax.f32 %v420_v47, 0.0 }
 0x100   : > { %v493_v50 = vmax.f32 %v415_v49, 0.0  ;;  %v1289_v51 = vpop.f32.mrb[2].mxu1 }
 0x101   : > { %v430_v53 = vadd.f32 %v1289_v51, %v1119_v45  ;;  %v424_v54 = vpop.f32.mrb[3].mxu1 }
 0x102   : > { %v425_v55 = vadd.f32 %v1119_v45, %v424_v54  ;;  %1340 = vmatprep.mubr.f32.mxu1 %v493_v50 }
 0x103   : > { %1341 = vmatmul.mubr.f32.vlgmr.msra.gmra.mrb[16].mxu1 %v494_v52  ;;  %v496_v58 = vmax.f32 %v430_v53, 0.0 }
 0x104   : > { %v495_v56 = vmax.f32 %v425_v55, 0.0  ;;  %v1292_v57 = vpop.f32.mrb[4].mxu1 }
 0x105   : > { %v440_v59 = vadd.f32 %v1292_v57, %v1119_v45  ;;  %v434_v60 = vpop.f32.mrb[5].mxu1 }
 0x106   : > { %v435_v61 = vadd.f32 %v1119_v45, %v434_v60  ;;  %1343 = vmatprep.mubr.f32.mxu1 %v495_v56 }
 0x107   : > { %1344 = vmatmul.mubr.f32.gmra.mrb[18].mxu1 %v496_v58  ;;  %v498_v0 = vmax.f32 %v440_v59, 0.0 }
 0x108   : > { %v497_v62 = vmax.f32 %v435_v61, 0.0  ;;  %v1295_v63 = vpop.f32.mrb[6].mxu1 }
 0x109   : > { %v450_v1 = vadd.f32 %v1295_v63, %v1119_v45  ;;  %v444_v2 = vpop.f32.mrb[7].mxu1 }
 0x10a   : > { %v445_v3 = vadd.f32 %v1119_v45, %v444_v2  ;;  %1346 = vmatprep.mubr.f32.mxu1 %v497_v62 }
 0x10b   : > { %1347 = vmatmul.mubr.f32.gmra.mrb[20].mxu1 %v498_v0  ;;  %v500_v6 = vmax.f32 %v450_v1, 0.0 }
 0x10c   : > { %v499_v4 = vmax.f32 %v445_v3, 0.0  ;;  %v1298_v5 = vpop.f32.mrb[8].mxu1 }
 0x10d   : > { %v460_v7 = vadd.f32 %v1298_v5, %v1119_v45  ;;  %v454_v8 = vpop.f32.mrb[9].mxu1 }
 0x10e   : > { %v455_v9 = vadd.f32 %v1119_v45, %v454_v8  ;;  %1349 = vmatprep.mubr.f32.mxu1 %v499_v4 }
 0x10f   : > { %1350 = vmatmul.mubr.f32.gmra.mrb[22].mxu1 %v500_v6  ;;  %v502_v12 = vmax.f32 %v460_v7, 0.0 }
 0x110   : > { %v501_v10 = vmax.f32 %v455_v9, 0.0  ;;  %v1301_v11 = vpop.f32.mrb[10].mxu1 }
 0x111   : > { %v470_v13 = vadd.f32 %v1301_v11, %v1119_v45  ;;  %v464_v14 = vpop.f32.mrb[11].mxu1 }
 0x112   : > { %v465_v15 = vadd.f32 %v1119_v45, %v464_v14  ;;  %1352 = vmatprep.mubr.f32.mxu1 %v501_v10 }
 0x113   : > { %1353 = vmatmul.mubr.f32.gmra.mrb[24].mxu1 %v502_v12  ;;  %v504_v18 = vmax.f32 %v470_v13, 0.0 }
 0x114   : > { %v503_v16 = vmax.f32 %v465_v15, 0.0  ;;  %v1304_v17 = vpop.f32.mrb[12].mxu1 }
 0x115   : > { %v480_v19 = vadd.f32 %v1304_v17, %v1119_v45  ;;  %v474_v20 = vpop.f32.mrb[13].mxu1 }
 0x116   : > { %v475_v21 = vadd.f32 %v1119_v45, %v474_v20  ;;  %1355 = vmatprep.mubr.f32.mxu1 %v503_v16 }
 0x117   : > { %1356 = vmatmul.mubr.f32.gmra.mrb[26].mxu1 %v504_v18  ;;  %v506_v24 = vmax.f32 %v480_v19, 0.0  ;;  %v1121_v18 = vld [vmem:[%s2009_s7] ss:$0 sm:$0xff] }
 0x118   : > { %v505_v22 = vmax.f32 %v475_v21, 0.0  ;;  %v1307_v23 = vpop.f32.mrb[14].mxu1 }
 0x119   : > { %v490_v25 = vadd.f32 %v1307_v23, %v1119_v45  ;;  %v484_v26 = vpop.f32.mrb[15].mxu1 }
 0x11a   : > { %v485_v27 = vadd.f32 %v1119_v45, %v484_v26  ;;  %1358 = vmatprep.mubr.f32.mxu1 %v505_v22 }
 0x11b   : > { %1359 = vmatmul.mubr.f32.gmra.mrb[28].mxu1 %v506_v24  ;;  %v508_v29 = vmax.f32 %v490_v25, 0.0 }
 0x11c   : > { %v507_v28 = vmax.f32 %v485_v27, 0.0 }
 0x11e   : > { %1361 = vmatprep.mubr.f32.mxu1 %v507_v28 }
 0x11f   : > { %1362 = vmatmul.mubr.f32.gmra.mrb[30].mxu1 %v508_v29 }
 0x1d6   : > { %v1342_v38 = vpop.f32.mrb[16].mxu1 }
 0x1d7   : > { %v604_v30 = vadd.f32 %v1342_v38, %v1120_v37  ;;  %v598_v31 = vpop.f32.mrb[17].mxu1 }
 0x1d8   : > { %v599_v39 = vadd.f32 %v1120_v37, %v598_v31 }
 0x1d9   : > { %v678_v42 = vmax.f32 %v604_v30, 0.0 }
 0x1da   : > { %v677_v35 = vmax.f32 %v599_v39, 0.0  ;;  %v1345_v36 = vpop.f32.mrb[18].mxu1 }
 0x1db   : > { %v614_v40 = vadd.f32 %v1345_v36, %v1120_v37  ;;  %v608_v41 = vpop.f32.mrb[19].mxu1 }
 0x1dc   : > { %v609_v43 = vadd.f32 %v1120_v37, %v608_v41  ;;  %1452 = vmatprep.mubr.f32.mxu0 %v677_v35 }
 0x1dd   : > { %1453 = vmatmul.mubr.f32.vlgmr.msra.gmra.mrb[0].mxu0 %v678_v42  ;;  %v680_v46 = vmax.f32 %v614_v40, 0.0 }
 0x1de   : > { %v679_v44 = vmax.f32 %v609_v43, 0.0  ;;  %v1348_v45 = vpop.f32.mrb[20].mxu1 }
 0x1df   : > { %v624_v47 = vadd.f32 %v1348_v45, %v1120_v37  ;;  %v618_v48 = vpop.f32.mrb[21].mxu1 }
 0x1e0   : > { %v619_v49 = vadd.f32 %v1120_v37, %v618_v48  ;;  %1455 = vmatprep.mubr.f32.mxu0 %v679_v44 }
 0x1e1   : > { %1456 = vmatmul.mubr.f32.gmra.mrb[2].mxu0 %v680_v46  ;;  %v682_v52 = vmax.f32 %v624_v47, 0.0 }
 0x1e2   : > { %v681_v50 = vmax.f32 %v619_v49, 0.0  ;;  %v1351_v51 = vpop.f32.mrb[22].mxu1 }
 0x1e3   : > { %v634_v53 = vadd.f32 %v1351_v51, %v1120_v37  ;;  %v628_v54 = vpop.f32.mrb[23].mxu1 }
 0x1e4   : > { %v629_v55 = vadd.f32 %v1120_v37, %v628_v54  ;;  %1458 = vmatprep.mubr.f32.mxu0 %v681_v50 }
 0x1e5   : > { %1459 = vmatmul.mubr.f32.gmra.mrb[4].mxu0 %v682_v52  ;;  %v684_v58 = vmax.f32 %v634_v53, 0.0 }
 0x1e6   : > { %v683_v56 = vmax.f32 %v629_v55, 0.0  ;;  %v1354_v57 = vpop.f32.mrb[24].mxu1 }
 0x1e7   : > { %v644_v59 = vadd.f32 %v1354_v57, %v1120_v37  ;;  %v638_v60 = vpop.f32.mrb[25].mxu1 }
 0x1e8   : > { %v639_v61 = vadd.f32 %v1120_v37, %v638_v60  ;;  %1461 = vmatprep.mubr.f32.mxu0 %v683_v56 }
 0x1e9   : > { %1462 = vmatmul.mubr.f32.gmra.mrb[6].mxu0 %v684_v58  ;;  %v686_v0 = vmax.f32 %v644_v59, 0.0 }
 0x1ea   : > { %v685_v62 = vmax.f32 %v639_v61, 0.0  ;;  %v1357_v63 = vpop.f32.mrb[26].mxu1 }
 0x1eb   : > { %v654_v1 = vadd.f32 %v1357_v63, %v1120_v37  ;;  %v648_v2 = vpop.f32.mrb[27].mxu1 }
 0x1ec   : > { %v649_v3 = vadd.f32 %v1120_v37, %v648_v2  ;;  %1464 = vmatprep.mubr.f32.mxu0 %v685_v62 }
 0x1ed   : > { %1465 = vmatmul.mubr.f32.gmra.mrb[8].mxu0 %v686_v0  ;;  %v688_v6 = vmax.f32 %v654_v1, 0.0 }
 0x1ee   : > { %v687_v4 = vmax.f32 %v649_v3, 0.0  ;;  %v1360_v5 = vpop.f32.mrb[28].mxu1 }
 0x1ef   : > { %v664_v7 = vadd.f32 %v1360_v5, %v1120_v37  ;;  %v658_v8 = vpop.f32.mrb[29].mxu1 }
 0x1f0   : > { %v659_v9 = vadd.f32 %v1120_v37, %v658_v8  ;;  %1467 = vmatprep.mubr.f32.mxu0 %v687_v4 }
 0x1f1   : > { %1468 = vmatmul.mubr.f32.gmra.mrb[10].mxu0 %v688_v6  ;;  %v690_v12 = vmax.f32 %v664_v7, 0.0 }
 0x1f2   : > { %v689_v10 = vmax.f32 %v659_v9, 0.0  ;;  %v1363_v11 = vpop.f32.mrb[30].mxu1 }
 0x1f3   : > { %v674_v13 = vadd.f32 %v1363_v11, %v1120_v37  ;;  %v668_v14 = vpop.f32.mrb[31].mxu1 }
 0x1f4   : > { %v669_v15 = vadd.f32 %v1120_v37, %v668_v14  ;;  %1470 = vmatprep.mubr.f32.mxu0 %v689_v10 }
 0x1f5   : > { %1471 = vmatmul.mubr.f32.gmra.mrb[12].mxu0 %v690_v12  ;;  %v692_v17 = vmax.f32 %v674_v13, 0.0 }
 0x1f6   : > { %v691_v16 = vmax.f32 %v669_v15, 0.0 }
 0x1f8   : > { %1473 = vmatprep.mubr.f32.mxu0 %v691_v16 }
 0x1f9   : > { %1474 = vmatmul.mubr.f32.gmra.mrb[14].mxu0 %v692_v17 }
 0x2b0   : > { %v1454_v19 = vpop.f32.mrb[0].mxu0 }
 0x2b1   : > { %v1023_v20 = vadd.f32 %v1454_v19, %v1121_v18  ;;  %v936_v21 = vpop.f32.mrb[1].mxu0 }
 0x2b2   : > { %v1022_v22 = vadd.f32 %v1121_v18, %v936_v21 }
 0x2b3   : > { %1039 = vst [vmem:[%s1981_s16 + $0x8] sm:$0xff] %v1023_v20 }
 0x2b4   : > { %1038 = vst [vmem:[%s1981_s16] sm:$0xff] %v1022_v22  ;;  %v1457_v23 = vpop.f32.mrb[2].mxu0 }
 0x2b5   : > { %v1025_v24 = vadd.f32 %v1457_v23, %v1121_v18  ;;  %v946_v25 = vpop.f32.mrb[3].mxu0 }
 0x2b6   : > { %v1024_v26 = vadd.f32 %v1121_v18, %v946_v25 }
 0x2b7   : > { %1041 = vst [vmem:[%s1981_s16 + $0x18] sm:$0xff] %v1025_v24 }
 0x2b8   : > { %1040 = vst [vmem:[%s1981_s16 + $0x10] sm:$0xff] %v1024_v26  ;;  %v1460_v27 = vpop.f32.mrb[4].mxu0 }
 0x2b9   : > { %v1027_v28 = vadd.f32 %v1460_v27, %v1121_v18  ;;  %v956_v29 = vpop.f32.mrb[5].mxu0 }
 0x2ba   : > { %v1026_v32 = vadd.f32 %v1121_v18, %v956_v29 }
 0x2bb   : > { %1043 = vst [vmem:[%s1981_s16 + $0x28] sm:$0xff] %v1027_v28 }
 0x2bc   : > { %1042 = vst [vmem:[%s1981_s16 + $0x20] sm:$0xff] %v1026_v32  ;;  %v1463_v33 = vpop.f32.mrb[6].mxu0 }
 0x2bd   : > { %v1029_v34 = vadd.f32 %v1463_v33, %v1121_v18  ;;  %v966_v37 = vpop.f32.mrb[7].mxu0 }
 0x2be   : > { %v1028_v38 = vadd.f32 %v1121_v18, %v966_v37 }
 0x2bf   : > { %1045 = vst [vmem:[%s1981_s16 + $0x38] sm:$0xff] %v1029_v34 }
 0x2c0   : > { %1044 = vst [vmem:[%s1981_s16 + $0x30] sm:$0xff] %v1028_v38  ;;  %v1466_v30 = vpop.f32.mrb[8].mxu0 }
 0x2c1   : > { %v1031_v31 = vadd.f32 %v1466_v30, %v1121_v18  ;;  %v976_v39 = vpop.f32.mrb[9].mxu0 }
 0x2c2   : > { %v1030_v35 = vadd.f32 %v1121_v18, %v976_v39 }
 0x2c3   : > { %1047 = vst [vmem:[%s1981_s16 + $0x48] sm:$0xff] %v1031_v31 }
 0x2c4   : > { %1046 = vst [vmem:[%s1981_s16 + $0x40] sm:$0xff] %v1030_v35  ;;  %v1469_v36 = vpop.f32.mrb[10].mxu0 }
 0x2c5   : > { %v1033_v42 = vadd.f32 %v1469_v36, %v1121_v18  ;;  %v986_v40 = vpop.f32.mrb[11].mxu0 }
 0x2c6   : > { %v1032_v41 = vadd.f32 %v1121_v18, %v986_v40 }
 0x2c7   : > { %1049 = vst [vmem:[%s1981_s16 + $0x58] sm:$0xff] %v1033_v42 }
 0x2c8   : > { %1048 = vst [vmem:[%s1981_s16 + $0x50] sm:$0xff] %v1032_v41  ;;  %v1472_v43 = vpop.f32.mrb[12].mxu0 }
 0x2c9   : > { %v1035_v44 = vadd.f32 %v1472_v43, %v1121_v18  ;;  %v996_v45 = vpop.f32.mrb[13].mxu0 }
 0x2ca   : > { %v1034_v46 = vadd.f32 %v1121_v18, %v996_v45 }
 0x2cb   : > { %1051 = vst [vmem:[%s1981_s16 + $0x68] sm:$0xff] %v1035_v44 }
 0x2cc   : > { %1050 = vst [vmem:[%s1981_s16 + $0x60] sm:$0xff] %v1034_v46  ;;  %v1475_v47 = vpop.f32.mrb[14].mxu0 }
 0x2cd   : > { %v1037_v48 = vadd.f32 %v1475_v47, %v1121_v18  ;;  %v1006_v49 = vpop.f32.mrb[15].mxu0 }
 0x2ce   : > { %v1036_v50 = vadd.f32 %v1121_v18, %v1006_v49 }
 0x2cf   : > { %1053 = vst [vmem:[%s1981_s16 + $0x78] sm:$0xff] %v1037_v48 }
 0x2d0   : > { %1052 = vst [vmem:[%s1981_s16 + $0x70] sm:$0xff] %v1036_v50 }
 0x2d1 PF: > { %s18_s27 = sadd.s32 1, %s1634_s27  }
 0x2d2   : > { %p15_p4 = scmp.ge.s32.totalorder %s18_s27, 4  }
 0x2d4   :  { %17 = sbr.rel (!%p15_p4) target bundleno = 1 (0x1), region = 82 }

</bundles_post_ra>
